<compile_context>
chip_gen: v5e
topology: v5e:2x2
jax: 0.10.0
libtpu: 0.0.40
codegen_flags: <defaults>
</compile_context>

<pallas_src>
import jax
import jax.numpy as jnp
from jax.experimental import pallas as pl
from jax.experimental.pallas import tpu as pltpu

K = 5  # fixed 5x5 kernels in the module


def _std_loss_kernel(x_ref, partial_ref):
    # x_ref:       (bt, C, H, W)  native dtype, one batch tile in VMEM
    # partial_ref: (1, 1, 1) f32  per-tile sum of squared differences
    x = x_ref[...].astype(jnp.float32)
    bt, C, H, W = x.shape
    Ho, Wo = H - (K - 1), W - (K - 1)

    # GrayscaleLayer: mean over the channel axis.
    gray = jnp.mean(x, axis=1)                      # (bt, H, W)

    # Separable 5x5 box sum (valid padding): horizontal 5-tap, then vertical.
    hsum = gray[:, :, 0:Wo]
    for dj in range(1, K):
        hsum = hsum + gray[:, :, dj:dj + Wo]        # (bt, H, Wo)
    vsum = hsum[:, 0:Ho, :]
    for di in range(1, K):
        vsum = vsum + hsum[:, di:di + Ho, :]        # (bt, Ho, Wo)
    blur = vsum * (1.0 / (K * K))

    # conv2d with the delta kernel (1 at [2,2]) == center crop.
    center = gray[:, 2:2 + Ho, 2:2 + Wo]            # (bt, Ho, Wo)

    diff = center - blur
    partial_ref[...] = jnp.reshape(jnp.sum(diff * diff), (1, 1, 1))


def std_loss(x, *, block_b=None):
    """x: (B, C, H, W) array (any float dtype). Returns scalar f32 loss."""
    B, C, H, W = x.shape
    assert H >= K and W >= K, "spatial dims must be >= 5"
    Ho, Wo = H - (K - 1), W - (K - 1)

    # Batch-tile size: keep a single input block around ~4 MiB so the
    # double-buffered pipeline fits comfortably on every generation
    # (v5e 16 MiB scoped default, v7x 64 MiB physical VMEM).
    elt = jnp.dtype(x.dtype).itemsize
    if block_b is None:
        budget_bytes = 4 * 1024 * 1024
        bt_max = max(1, budget_bytes // (C * H * W * elt))
        block_b = 1
        for d in range(1, B + 1):          # largest divisor of B that fits
            if B % d == 0 and d <= bt_max:
                block_b = d
    assert B % block_b == 0, "block_b must divide B"
    num_tiles = B // block_b

    partials = pl.pallas_call(
        _std_loss_kernel,
        out_shape=jax.ShapeDtypeStruct((num_tiles, 1, 1), jnp.float32),
        grid=(num_tiles,),
        in_specs=[pl.BlockSpec((block_b, C, H, W), lambda i: (i, 0, 0, 0))],
        out_specs=pl.BlockSpec((1, 1, 1), lambda i: (i, 0, 0)),
        compiler_params=pltpu.CompilerParams(
            dimension_semantics=("parallel",),
            vmem_limit_bytes=32 * 1024 * 1024,
        ),
    )(x)  # native dtype straight from HBM; cast happens inside the kernel

    return jnp.sum(partials) / jnp.float32(B * Ho * Wo)


def std_loss_ref(x):
    """Pure-JAX reference for correctness check."""
    x = x.astype(jnp.float32)
    gray = jnp.mean(x, axis=1)                      # (B, H, W)
    B, H, W = gray.shape
    Ho, Wo = H - (K - 1), W - (K - 1)
    center = gray[:, 2:2 + Ho, 2:2 + Wo]
    acc = jnp.zeros((B, Ho, Wo), jnp.float32)
    for di in range(K):
        for dj in range(K):
            acc = acc + gray[:, di:di + Ho, dj:dj + Wo]
    blur = acc / (K * K)
    return jnp.mean((center - blur) ** 2)


if __name__ == "__main__":
    key = jax.random.PRNGKey(0)
    x = jax.random.normal(key, (2, 4, 16, 16), dtype=jnp.float32)

    # block_b=1 forces grid=(2,) so the multi-tile partial-sum path is tested.
    loss = jax.block_until_ready(std_loss(x, block_b=1))
    ref = jax.block_until_ready(std_loss_ref(x))
    assert jnp.allclose(loss, ref, rtol=1e-5, atol=1e-6), (loss, ref)

    # Default (auto) tile size path as well.
    loss2 = jax.block_until_ready(std_loss(x))
    assert jnp.allclose(loss2, ref, rtol=1e-5, atol=1e-6), (loss2, ref)

    print("KERNEL_OK")
</pallas_src>

<mosaic_0001>
module attributes {stable_mosaic.version = 11 : i64} {
  func.func @_std_loss_kernel(%arg0: i32, %arg1: memref<1x4x16x16xf32, #tpu.memory_space<vmem>>, %arg2: memref<1x1x1xf32, #tpu.memory_space<vmem>>) attributes {dimension_semantics = [#tpu.dimension_semantics<parallel>], iteration_bounds = array<i64: 2>, scalar_prefetch = 0 : i64, scratch_operands = 0 : i64, tpu.core_type = #tpu.core_type<tc>, window_params = [{transform_indices = @transform_0, window_bounds = array<i64: 1, 4, 16, 16>}, {transform_indices = @transform_1, window_bounds = array<i64: 1, 1, 1>}]} {
    %c0 = arith.constant 0 : index
    %c0_0 = arith.constant 0 : index
    %c0_1 = arith.constant 0 : index
    %c0_2 = arith.constant 0 : index
    %0 = vector.load %arg1[%c0, %c0_0, %c0_1, %c0_2] : memref<1x4x16x16xf32, #tpu.memory_space<vmem>>, vector<1x4x16x16xf32>
    %cst = arith.constant dense<0.000000e+00> : vector<1x16x16xf32>
    %1 = vector.multi_reduction <add>, %0, %cst [1] : vector<1x4x16x16xf32> to vector<1x16x16xf32>
    %cst_3 = arith.constant 4.000000e+00 : f32
    %2 = vector.broadcast %cst_3 : f32 to vector<1x16x16xf32>
    %3 = arith.divf %1, %2 : vector<1x16x16xf32>
    %4 = vector.extract_strided_slice %3 {offsets = [0, 0, 0], sizes = [1, 16, 12], strides = [1, 1, 1]} : vector<1x16x16xf32> to vector<1x16x12xf32>
    %5 = vector.extract_strided_slice %3 {offsets = [0, 0, 1], sizes = [1, 16, 12], strides = [1, 1, 1]} : vector<1x16x16xf32> to vector<1x16x12xf32>
    %6 = arith.addf %4, %5 : vector<1x16x12xf32>
    %7 = vector.extract_strided_slice %3 {offsets = [0, 0, 2], sizes = [1, 16, 12], strides = [1, 1, 1]} : vector<1x16x16xf32> to vector<1x16x12xf32>
    %8 = arith.addf %6, %7 : vector<1x16x12xf32>
    %9 = vector.extract_strided_slice %3 {offsets = [0, 0, 3], sizes = [1, 16, 12], strides = [1, 1, 1]} : vector<1x16x16xf32> to vector<1x16x12xf32>
    %10 = arith.addf %8, %9 : vector<1x16x12xf32>
    %11 = vector.extract_strided_slice %3 {offsets = [0, 0, 4], sizes = [1, 16, 12], strides = [1, 1, 1]} : vector<1x16x16xf32> to vector<1x16x12xf32>
    %12 = arith.addf %10, %11 : vector<1x16x12xf32>
    %13 = vector.extract_strided_slice %12 {offsets = [0, 0, 0], sizes = [1, 12, 12], strides = [1, 1, 1]} : vector<1x16x12xf32> to vector<1x12x12xf32>
    %14 = vector.extract_strided_slice %12 {offsets = [0, 1, 0], sizes = [1, 12, 12], strides = [1, 1, 1]} : vector<1x16x12xf32> to vector<1x12x12xf32>
    %15 = arith.addf %13, %14 : vector<1x12x12xf32>
    %16 = vector.extract_strided_slice %12 {offsets = [0, 2, 0], sizes = [1, 12, 12], strides = [1, 1, 1]} : vector<1x16x12xf32> to vector<1x12x12xf32>
    %17 = arith.addf %15, %16 : vector<1x12x12xf32>
    %18 = vector.extract_strided_slice %12 {offsets = [0, 3, 0], sizes = [1, 12, 12], strides = [1, 1, 1]} : vector<1x16x12xf32> to vector<1x12x12xf32>
    %19 = arith.addf %17, %18 : vector<1x12x12xf32>
    %20 = vector.extract_strided_slice %12 {offsets = [0, 4, 0], sizes = [1, 12, 12], strides = [1, 1, 1]} : vector<1x16x12xf32> to vector<1x12x12xf32>
    %21 = arith.addf %19, %20 : vector<1x12x12xf32>
    %cst_4 = arith.constant 4.000000e-02 : f32
    %22 = vector.broadcast %cst_4 : f32 to vector<1x12x12xf32>
    %23 = arith.mulf %21, %22 : vector<1x12x12xf32>
    %24 = vector.extract_strided_slice %3 {offsets = [0, 2, 2], sizes = [1, 12, 12], strides = [1, 1, 1]} : vector<1x16x16xf32> to vector<1x12x12xf32>
    %25 = arith.subf %24, %23 : vector<1x12x12xf32>
    %26 = arith.mulf %25, %25 : vector<1x12x12xf32>
    %27 = vector.shape_cast %26 : vector<1x12x12xf32> to vector<1x1x12x12xf32>
    %cst_5 = arith.constant dense<0.000000e+00> : vector<1xf32>
    %28 = vector.multi_reduction <add>, %27, %cst_5 [1, 2, 3] : vector<1x1x12x12xf32> to vector<1xf32>
    %29 = vector.shape_cast %28 : vector<1xf32> to vector<1x1x1x1xf32>
    %30 = vector.extract %29[0, 0, 0, 0] : f32 from vector<1x1x1x1xf32>
    %31 = vector.broadcast %30 : f32 to vector<1x1x1xf32>
    %c0_6 = arith.constant 0 : index
    %c0_7 = arith.constant 0 : index
    %c0_8 = arith.constant 0 : index
    %32 = vector.load %arg2[%c0_6, %c0_7, %c0_8] : memref<1x1x1xf32, #tpu.memory_space<vmem>>, vector<1x1x1xf32>
    tpu.vector_store %arg2[%c0_6, %c0_7, %c0_8], %31 {strides = array<i32>} : memref<1x1x1xf32, #tpu.memory_space<vmem>>, vector<1x1x1xf32>,
    return
  }
  func.func @transform_0(%arg0: i32) -> (i32, i32, i32, i32) {
    %c0_i32 = arith.constant 0 : i32
    %c0_i32_0 = arith.constant 0 : i32
    %c0_i32_1 = arith.constant 0 : i32
    %c0_i32_2 = arith.constant 0 : i32
    return %arg0, %c0_i32, %c0_i32_0, %c0_i32_1 : i32, i32, i32, i32
  }
  func.func @transform_1(%arg0: i32) -> (i32, i32, i32) {
    %c0_i32 = arith.constant 0 : i32
    %c0_i32_0 = arith.constant 0 : i32
    %c0_i32_1 = arith.constant 0 : i32
    return %arg0, %c0_i32, %c0_i32_0 : i32, i32, i32
  }
}

</mosaic_0001>

<bundles_post_ra>
// kernel: tpu_custom_call.1
= control target key start
LH: loop header
LB: loop body
LE: loop exit
PB: predicated region body
PF: predicated region fallthrough
CT: control target
= control target key end

     0   :  { %6 = vsyncpa [#allocation3], 0  ;;  %s600_s0 = inlined_call_operand.hbm [shape: f32[2,4,16,16], index: 0, kind: input, shape index: {}]   ;;  %s601_s1 = inlined_call_operand.vmem [shape: f32[2,1,1], index: 1, kind: output, shape index: {}]  }
   0x1   :  { %8 = vsyncpa [#allocation3 + $0x1], 0  ;;  %s486_s6 = smov 0   ;;  %s488_s7 = smov 0  }
   0x2   :  { %s490_s8 = smov 0   ;;  %s492_s9 = smov 0  }
   0x3 LB: > { %s505_s10 = sadd.s32 4294967295, %s466_s9   ;;  %s508_s11 = sadd.s32 1, %s466_s9   ;;  %s466_s9 = sphi %s492_s9, %s608_s9   ;;  %s462_s8 = sphi %s490_s8, %s607_s8   ;;  %s458_s7 = sphi %s488_s7, %s606_s7   ;;  %s454_s6 = sphi %s486_s6, %s605_s6  }
   0x4   : > { %s18_s12 = ssub.s32 %s466_s9, %s508_s11  ;;  %s21_s13 = sadd.s32 1, %s462_s8 }
   0x5   : > { %p19_p0 = scmp.eq.s32.totalorder %s18_s12, 0  ;;  %p28_p1 = scmp.ne.s32.totalorder %s462_s8, %s458_s7 }
   0x6   : > { %p29_p2 = scmp.eq.s32.totalorder %s466_s9, 0  ;;  %p34_p3 = scmp.ne.s32.totalorder %s458_s7, %s454_s6 }
   0x7   : > { %s518_s14 = scalar_select %p19_p0, %s462_s8, %s21_s13  }
   0x8   : > { %p520_p4 = por %p29_p2, %p28_p1  ;;  %p35_p5 = scmp.eq.s32.totalorder %s505_s10, 0 }
   0x9   : > { %p359_p6 = scmp.lt.s32.totalorder %s466_s9, 2  ;;  %s84_s17 = sand.u32 1, %s462_s8  }
   0xa   : > { %p526_p7 = por %p35_p5, %p34_p3  ;;  %s343_s18 = sshll.u32 %s84_s17, 6 }
   0xb   : > { %s350_s19 = sshll.u32 %s466_s9, 6  ;;  %s88_s23 = scalar_lea.vmem [#allocation2], %s343_s18 }
   0xc   : > { %s93_s22 = scalar_lea.hbm %s600_s0, %s350_s19  ;;  %s96_s24 = sshll.u32 %s88_s23, 4  ;;  %s97_s24 = int_to_ptr.vmem [resolvable:$true] %s96_s24 }
   0xd   : > { %s94_s25 = sshll.u32 %s93_s22, 4  ;;  %p537_p8 = pnand %p359_p6, %p520_p4  ;;  %s95_s25 = int_to_ptr.hbm [resolvable:$true] %s94_s25 }
   0xe   : > { %p346_p9 = scmp.ge.s32.totalorder %s466_s9, 1  ;;  %s85_s27 = scalar_lea.sflag [#allocation3], %s84_s17 }
   0xf   : > { %s402_s28 = sshra.s32 %s95_s25, 4  ;;  %p406_p11 = pneg %p537_p8  ;;  %s403_s28 = int_to_ptr.hbm [resolvable:$true] %s402_s28 }
  0x10   : > { %s404_s29 = scalar_lea.hbm %s403_s28, 64  ;;  %s409_s3 = scalar_lea.hbm %s600_s0, 128 }
  0x11   : > { %p405_p10 = scmp.ne.s32.totalorder %s403_s28, %s404_s29  ;;  %p410_p0 = scmp.lt.s32.totalorder %s403_s28, %s600_s0 }
  0x12   : > { %p411_p1 = scmp.lt.s32.totalorder %s409_s3, %s404_s29 }
  0x13   : > { %p407_p12 = pnand %p406_p11, %p405_p10 }
  0x14   : > { %p412_p2 = por %p411_p1, %p410_p0 }
  0x15   : > { %p408_p13 = pneg %p407_p12 }
  0x17   : > { %p413_p3 = pnand %p412_p2, %p408_p13 }
  0x19   : > { %416 = shalt.err (!%p413_p3)
}
  0x1a   : > { %s468_s6 = smov 128   ;;  %s469_s12 = smov 8  }
  0x1b   : > { %358 = dma.hbm_to_vmem [thread:$0]  (!%p537_p8), %s95_s25, 1024, %s97_s24, %s85_s27, %s468_s6, %s468_s6, %s469_s12  }
  0x1c   : > { %p104_p4 = scmp.lt.s32.totalorder %s466_s9, 3 }
  0x1e   : > { %p105_p5 = pnand %p346_p9, %p104_p4 }
  0x1f   : > { %s110_s13 = sand.u32 (!%p105_p5), 1, %s458_s7  }
  0x20   : > { %108 = sbr.rel (%p105_p5) target bundleno = 626 (0x272), region = 24  ;;  %s347_s15 = sshll.u32 (!%p105_p5), %s110_s13, 6 }
  0x21   : > { %s111_s17 = scalar_lea.sflag (!%p105_p5), [#allocation3], %s110_s13  ;;  %s114_s18 = scalar_lea.vmem (!%p105_p5), [#allocation2], %s347_s15 }
  0x25   : > { %449 = dma.done.wait (%p526_p7), %s111_s17, 1024  }
  0x26   : > { %451 = vsyncadd (%p526_p7), %s111_s17, 4294966272  ;;  %v470_v0 = vmov 4.0   ;;  %vm143_vm0 = vcmask 130048   ;;  %v135_v2 = vld [vmem:[%s114_s18] sm:$0xff]  ;;  %v137_v3 = vld [vmem:[%s114_s18 + $0x10] sm:$0xff]  ;;  %s471_s9 = smov 126  }
  0x27   : > { %400 = vrcp.f32 %v470_v0  ;;  %v139_v4 = vld [vmem:[%s114_s18 + $0x20] sm:$0xff]  ;;  %v141_v5 = vld [vmem:[%s114_s18 + $0x30] sm:$0xff]  ;;  %v144_v6 = vsel %vm143_vm0, %v135_v2, 0.0  ;;  %v145_v7 = vsel %vm143_vm0, %v137_v3, 0.0  ;;  %v136_v10 = vld [vmem:[%s114_s18 + $0x8] sm:$0xff]  ;;  %s472_s16 = smov 127  }
  0x28   : > { %v147_v8 = vsel %vm143_vm0, %v139_v4, 0.0  ;;  %v146_v11 = vadd.f32 %v145_v7, %v144_v6  ;;  %v138_v12 = vld [vmem:[%s114_s18 + $0x18] sm:$0xff]  ;;  %v140_v13 = vld [vmem:[%s114_s18 + $0x28] sm:$0xff]  ;;  %v151_v14 = vsel %vm143_vm0, %v136_v10, 0.0  ;;  %v149_v15 = vsel %vm143_vm0, %v141_v5, 0.0  ;;  %s473_s19 = smov 125  }
  0x29   : > { %v152_v17 = vsel %vm143_vm0, %v138_v12, 0.0  ;;  %v154_v21 = vsel %vm143_vm0, %v140_v13, 0.0  ;;  %v142_v23 = vld [vmem:[%s114_s18 + $0x38] sm:$0xff]  ;;  %s474_s20 = smov 124   ;;  %vm203_vm2 = vcmask 1046528   ;;  %vm211_vm3 = vcmask 1045504  }
  0x2a   : > { %v148_v18 = vadd.f32 %v147_v8, %v146_v11  ;;  %v153_v19 = vadd.f32 %v152_v17, %v151_v14  ;;  %v156_v27 = vsel %vm143_vm0, %v142_v23, 0.0  ;;  %vm219_vm4 = vcmask 1044480   ;;  %s475_s21 = smov 2   ;;  %p132_p6 = scmp.lt.s32.totalorder %s505_s10, 1 }
  0x2b   : > { %vm227_vm5 = vcmask 1043456   ;;  %vm239_vm6 = vcmask 1041408   ;;  %vm266_vm7 = vcmask 93184   ;;  %vm264_vm8 = vcmask 97280  }
  0x2c   : > { %v150_v22 = vadd.f32 %v149_v15, %v148_v18  ;;  %v155_v25 = vadd.f32 %v154_v21, %v153_v19  ;;  %s610_s10 = smov (!%p132_p6, %s505_s10), 1  ;;  %vm279_vm9 = vcmask 0  }
  0x2d   : > { %v401_v1 = vpop.eup %400  ;;  %s134_s24 = scalar_lea.vmem %s601_s1, %s610_s10 }
  0x2e   : > { %v159_v9 = vmul.f32 4.0, %v401_v1  ;;  %vm163_vm1 = vweird.f32 %v401_v1  ;;  %v157_v29 = vadd.f32 %v156_v27, %v155_v25 }
  0x30   : > { %v160_v16 = vsub.f32 1.0, %v159_v9 }
  0x32   : > { %v161_v20 = vmul.f32 %v401_v1, %v160_v16 }
  0x34   : > { %v162_v24 = vadd.f32 %v401_v1, %v161_v20 }
  0x36   : > { %v164_v26 = vsel %vm163_vm1, %v401_v1, %v162_v24 }
  0x37   : > { %v568_v28 = vmul.f32 %v164_v26, %v150_v22  ;;  %v166_v30 = vmul.f32 %v164_v26, %v157_v29 }
  0x39   : > { %177 = vrot.lane.b32.xlu1 %v568_v28, %s471_s9  ;;  %169 = vrot.lane.b32.xlu0 %v568_v28, %s472_s16 }
  0x3a   : > { %185 = vrot.lane.b32.xlu2 %v568_v28, %s473_s19 }
  0x41   : > { %179 = vrot.lane.b32.xlu1 %v166_v30, %s471_s9  ;;  %171 = vrot.lane.b32.xlu0 %v166_v30, %s472_s16 }
  0x42   : > { %187 = vrot.lane.b32.xlu2 %v166_v30, %s473_s19 }
  0x49   : > { %195 = vrot.lane.b32.xlu1 %v166_v30, %s474_s20  ;;  %193 = vrot.lane.b32.xlu0 %v568_v28, %s474_s20 }
  0x94   : > { %v186_v33 = vpop.permute.xlu2 %185 }
  0x9c   : > { %v188_v40 = vpop.permute.xlu2 %187 }
  0xab   : > { %v178_v31 = vpop.permute.xlu1 %177  ;;  %v170_v32 = vpop.permute.xlu0 %169 }
  0xac   : > { %v175_v34 = vadd.f32 %v170_v32, %v568_v28 }
  0xae   : > { %v183_v38 = vadd.f32 %v178_v31, %v175_v34 }
  0xb0   : > { %v191_v41 = vadd.f32 %v186_v33, %v183_v38 }
  0xb3   : > { %v180_v35 = vpop.permute.xlu1 %179  ;;  %v172_v36 = vpop.permute.xlu0 %171 }
  0xb4   : > { %v176_v37 = vadd.f32 %v172_v36, %v166_v30 }
  0xb6   : > { %v184_v39 = vadd.f32 %v180_v35, %v176_v37 }
  0xb8   : > { %v192_v42 = vadd.f32 %v188_v40, %v184_v39 }
  0xbb   : > { %v196_v43 = vpop.permute.xlu1 %195  ;;  %v194_v44 = vpop.permute.xlu0 %193 }
  0xbc   : > { %v200_v45 = vadd.f32 %v196_v43, %v192_v42  ;;  %v199_v46 = vadd.f32 %v194_v44, %v191_v41 }
  0xbe   : > { %v205_v47 = vrot.slane %v200_v45, 1  ;;  %v213_v48 = vrot.slane %v200_v45, 2  ;;  %v204_v49 = vrot.slane %v199_v46, 1  ;;  %v212_v50 = vrot.slane %v199_v46, 2 }
  0xbf   : > { %v220_v53 = vrot.slane %v199_v46, 3  ;;  %v221_v54 = vrot.slane %v200_v45, 3  ;;  %v228_v57 = vrot.slane %v199_v46, 4  ;;  %v229_v58 = vrot.slane %v200_v45, 4 }
  0xc0   : > { %v210_v51 = vadd.f32 %v205_v47, %v200_v45  ;;  %v206_v52 = vsel %vm203_vm2, %v204_v49, %v205_v47  ;;  %v214_v56 = vsel %vm211_vm3, %v212_v50, %v213_v48 }
  0xc1   : > { %v209_v55 = vadd.f32 %v206_v52, %v199_v46  ;;  %v222_v61 = vsel %vm219_vm4, %v220_v53, %v221_v54  ;;  %v230_v0 = vsel %vm227_vm5, %v228_v57, %v229_v58 }
  0xc2   : > { %v218_v59 = vadd.f32 %v213_v48, %v210_v51 }
  0xc3   : > { %v217_v60 = vadd.f32 %v214_v56, %v209_v55 }
  0xc4   : > { %v226_v62 = vadd.f32 %v221_v54, %v218_v59 }
  0xc5   : > { %v225_v63 = vadd.f32 %v222_v61, %v217_v60 }
  0xc6   : > { %v234_v1 = vadd.f32 %v229_v58, %v226_v62 }
  0xc7   : > { %v233_v2 = vadd.f32 %v230_v0, %v225_v63 }
  0xc8   : > { %v236_v3 = vmul.f32 0.04, %v234_v1 }
  0xc9   : > { %v235_v4 = vmul.f32 0.04, %v233_v2 }
  0xca   : > { %v241_v5 = vrot.slane %v236_v3, 6 }
  0xcb   : > { %v240_v6 = vrot.slane %v235_v4, 6 }
  0xcd   : > { %243 = vrot.lane.b32.xlu2 %v240_v6, %s475_s21  ;;  %v242_v7 = vsel %vm239_vm6, %v240_v6, %v241_v5 }
  0xce   : > { %245 = vrot.lane.b32.xlu0 %v242_v7, %s475_s21 }
 0x127   : > { %v244_v8 = vpop.permute.xlu2 %243 }
 0x128   : > { %v249_v9 = vsub.f32 %v568_v28, %v244_v8 }
 0x12a   : > { %v251_v11 = vmul.f32 %v249_v9, %v249_v9 }
 0x12c   : > { %v255_v14 = vrot.slane %v251_v11, 2 }
 0x140   : > { %v246_v10 = vpop.permute.xlu0 %245 }
 0x141   : > { %v250_v12 = vsub.f32 %v166_v30, %v246_v10 }
 0x143   : > { %v252_v13 = vmul.f32 %v250_v12, %v250_v12 }
 0x145   : > { %v256_v15 = vrot.slane %v252_v13, 2 }
 0x147   : > { %260 = vrot.lane.b32.xlu2 %v256_v15, %s471_s9  ;;  %v257_v16 = vsel %vm211_vm3, %v255_v14, %v256_v15 }
 0x148   : > { %258 = vrot.lane.b32.xlu1 %v257_v16, %s471_s9 }
 0x1a1   : > { %v261_v17 = vpop.permute.xlu2 %260 }
 0x1a2   : > { %v267_v19 = vsel %vm266_vm7, %v261_v17, 0.0 }
 0x1ba   : > { %v259_v18 = vpop.permute.xlu1 %258 }
 0x1bb   : > { %v265_v20 = vsel %vm264_vm8, %v259_v18, 0.0 }
 0x1bc   : > { %v268_v21 = vadd.f32 %v267_v19, %v265_v20 }
 0x1be   : > { %269 = vadd.xlane.f32.xlu0 %v268_v21 }
 0x231   : > { %v270_v22 = vpop.xlane.xlu0 %269 }
 0x232   : > { %v271_v23 = vrot.slane %v270_v22, 4 }
 0x234   : > { %v272_v24 = vadd.f32 %v271_v23, %v270_v22 }
 0x236   : > { %v273_v25 = vrot.slane %v272_v24, 2 }
 0x238   : > { %v274_v26 = vadd.f32 %v273_v25, %v272_v24 }
 0x23a   : > { %v275_v27 = vrot.slane %v274_v26, 1 }
 0x23c   : > { %v276_v28 = vadd.f32 %v275_v27, %v274_v26 }
 0x23e   : > { %351 = vpush %v276_v28 }
 0x26f   : > { %s352_s25 = spop %351 }
 0x270   : > { %v278_v29 = vstv %s352_s25 }
 0x271   : > { %280 = vst.msk [vmem:[%s134_s24] sm:$0x1] %vm279_vm9, %v278_v29 }
 0x272 PF: > { %p11_p7 = scmp.ge.s32.totalorder %s508_s11, 4   ;;  %s605_s6 = smov %s458_s7 }
 0x273   : > { %s606_s7 = smov %s462_s8  ;;  %s607_s8 = smov %s518_s14 }
 0x274   : > { %s608_s9 = smov %s508_s11  ;;  %13 = sbr.rel (!%p11_p7) target bundleno = 3 (0x3), region = 64 }
 0x279   :  { %298 = vsyncpa [#allocation3], 1 }
 0x27a   :  { %300 = vsyncpa [#allocation3 + $0x1], 1 }

</bundles_post_ra>
